<compile_context>
chip_gen: v6e
topology: v6e:2x2x1
jax: 0.10.0
libtpu: 0.0.40
codegen_flags: <defaults>
</compile_context>

<pallas_src>
import jax
import jax.numpy as jnp
from jax.experimental import pallas as pl
from jax.experimental.pallas import tpu as pltpu


def _round_up(n, m):
    return ((n + m - 1) // m) * m


def _mlp_kernel(x_ref, w1_ref, b1_ref, w2_ref, b2_ref, o_ref):
    # x_ref: (tm, Cin) in the caller's native dtype; cast to bf16 on the VPU.
    x = x_ref[...].astype(w1_ref.dtype)
    # Linear 1 (MXU, f32 accumulate) + bias + ReLU in f32.
    h = jnp.dot(x, w1_ref[...], preferred_element_type=jnp.float32)
    h = jnp.maximum(h + b1_ref[...], 0.0)
    # Linear 2 (bf16 operands, f32 accumulate) + bias + sigmoid in f32.
    y = jnp.dot(h.astype(w2_ref.dtype), w2_ref[...],
                preferred_element_type=jnp.float32)
    y = y + b2_ref[...]
    # Store only the Cout real columns (no lane padding).
    o_ref[...] = jax.nn.sigmoid(y).astype(o_ref.dtype)


def slot_attention_classifier(x, w1, b1, w2, b2, *, tile_m=8192,
                              compute_dtype=jnp.bfloat16, out_dtype=None):
    """x: [B, S, Cin]; w1: [Cin, Cin]; b1: [Cin]; w2: [Cin, Cout]; b2: [Cout].

    Weights are in [in, out] layout (transposed PyTorch nn.Linear convention).
    """
    B, S, Cin = x.shape
    Cout = w2.shape[1]
    M = B * S
    out_dtype = x.dtype if out_dtype is None else out_dtype

    # Row tile: multiple of 8 (f32 sublane).  Keep >= 2 tiles when possible so
    # the "parallel" axis can actually be sharded across v7x's two TensorCores.
    tm = min(int(tile_m), max(8, _round_up(pl.cdiv(M, 2), 8)))
    grid = pl.cdiv(M, tm)
    m_pad = grid * tm

    # x stays in its native dtype; only pad M when the last tile would be ragged.
    x2d = x.reshape(M, Cin)
    if m_pad != M:
        x2d = jnp.pad(x2d, ((0, m_pad - M), (0, 0)))

    w1c = w1.astype(compute_dtype)
    b1_2d = b1.reshape(1, Cin).astype(jnp.float32)
    w2c = w2.astype(compute_dtype)
    b2_2d = b2.reshape(1, Cout).astype(jnp.float32)

    out2d = pl.pallas_call(
        _mlp_kernel,
        out_shape=jax.ShapeDtypeStruct((m_pad, Cout), out_dtype),
        grid_spec=pltpu.PrefetchScalarGridSpec(
            num_scalar_prefetch=0,
            grid=(grid,),
            in_specs=[
                pl.BlockSpec((tm, Cin), lambda i: (i, 0)),     # x tile (pipelined)
                pl.BlockSpec((Cin, Cin), lambda i: (0, 0)),    # w1 (VMEM-resident)
                pl.BlockSpec((1, Cin), lambda i: (0, 0)),      # b1 (VMEM-resident)
                pl.BlockSpec((Cin, Cout), lambda i: (0, 0)),   # w2 (VMEM-resident)
                pl.BlockSpec((1, Cout), lambda i: (0, 0)),     # b2 (VMEM-resident)
            ],
            out_specs=pl.BlockSpec((tm, Cout), lambda i: (i, 0)),
        ),
        compiler_params=pltpu.CompilerParams(
            dimension_semantics=("parallel",)),                # megacore on v7x
    )(x2d, w1c, b1_2d, w2c, b2_2d)

    if m_pad != M:
        out2d = out2d[:M]
    return out2d.reshape(B, S, Cout)


def _ref_forward(x, w1, b1, w2, b2, compute_dtype=jnp.float32):
    """Pure-JAX reference (PyTorch nn.Sequential semantics), optionally
    mirroring the kernel's bf16-operand / f32-accumulate matmuls."""
    B, S, Cin = x.shape
    x2d = x.reshape(B * S, Cin).astype(compute_dtype)
    h = jnp.dot(x2d, w1.astype(compute_dtype),
                preferred_element_type=jnp.float32) + b1.astype(jnp.float32)
    h = jnp.maximum(h, 0.0)
    y = jnp.dot(h.astype(compute_dtype), w2.astype(compute_dtype),
                preferred_element_type=jnp.float32) + b2.astype(jnp.float32)
    return jax.nn.sigmoid(y).reshape(B, S, w2.shape[1])


if __name__ == "__main__":
    # Small shapes consistent with the module: per-slot feature vectors.
    batch, num_slots = 2, 8
    in_channels, out_channels = 32, 16

    key = jax.random.PRNGKey(0)
    kx, kw1, kb1, kw2, kb2 = jax.random.split(key, 5)

    x = jax.random.normal(kx, (batch, num_slots, in_channels), dtype=jnp.float32)

    # Deterministic parameter init (PyTorch Linear default-ish uniform scale),
    # stored directly in [in, out] layout.
    s1 = 1.0 / jnp.sqrt(in_channels)
    w1 = jax.random.uniform(kw1, (in_channels, in_channels), minval=-s1, maxval=s1)
    b1 = jax.random.uniform(kb1, (in_channels,), minval=-s1, maxval=s1)
    w2 = jax.random.uniform(kw2, (in_channels, out_channels), minval=-s1, maxval=s1)
    b2 = jax.random.uniform(kb2, (out_channels,), minval=-s1, maxval=s1)

    out = slot_attention_classifier(x, w1, b1, w2, b2)
    out = jax.block_until_ready(out)
    assert out.shape == (batch, num_slots, out_channels)

    # Check vs a reference that mirrors the kernel's bf16-operand matmuls.
    ref_matched = _ref_forward(x, w1, b1, w2, b2, compute_dtype=jnp.bfloat16)
    assert jnp.allclose(out, ref_matched, atol=1e-5, rtol=1e-5), \
        "mismatch vs bf16-matched reference"

    # Sanity check vs the full-f32 PyTorch-equivalent forward (bf16 operand
    # error through sigmoid stays well below 2e-2).
    ref_f32 = _ref_forward(x, w1, b1, w2, b2, compute_dtype=jnp.float32)
    assert jnp.allclose(out, ref_f32, atol=2e-2), "mismatch vs f32 reference"

    print("KERNEL_OK")
</pallas_src>

<mosaic_0001>
module attributes {stable_mosaic.version = 11 : i64} {
  func.func @_mlp_kernel(%arg0: i32, %arg1: memref<8x32xf32, #tpu.memory_space<vmem>>, %arg2: memref<32x32xbf16, #tpu.memory_space<vmem>>, %arg3: memref<1x32xf32, #tpu.memory_space<vmem>>, %arg4: memref<32x16xbf16, #tpu.memory_space<vmem>>, %arg5: memref<1x16xf32, #tpu.memory_space<vmem>>, %arg6: memref<8x16xf32, #tpu.memory_space<vmem>>) attributes {dimension_semantics = [#tpu.dimension_semantics<parallel>], iteration_bounds = array<i64: 2>, scalar_prefetch = 0 : i64, scratch_operands = 0 : i64, tpu.core_type = #tpu.core_type<tc>, window_params = [{transform_indices = @transform_0, window_bounds = array<i64: 8, 32>}, {pipeline_mode = #tpu.pipeline_mode<synchronous>, transform_indices = @transform_1, window_bounds = array<i64: 32, 32>}, {pipeline_mode = #tpu.pipeline_mode<synchronous>, transform_indices = @transform_2, window_bounds = array<i64: 1, 32>}, {pipeline_mode = #tpu.pipeline_mode<synchronous>, transform_indices = @transform_3, window_bounds = array<i64: 32, 16>}, {pipeline_mode = #tpu.pipeline_mode<synchronous>, transform_indices = @transform_4, window_bounds = array<i64: 1, 16>}, {transform_indices = @transform_5, window_bounds = array<i64: 8, 16>}]} {
    %c0 = arith.constant 0 : index
    %c0_0 = arith.constant 0 : index
    %0 = vector.load %arg1[%c0, %c0_0] : memref<8x32xf32, #tpu.memory_space<vmem>>, vector<8x32xf32>
    %1 = arith.truncf %0 : vector<8x32xf32> to vector<8x32xbf16>
    %c0_1 = arith.constant 0 : index
    %c0_2 = arith.constant 0 : index
    %2 = vector.load %arg2[%c0_1, %c0_2] : memref<32x32xbf16, #tpu.memory_space<vmem>>, vector<32x32xbf16>
    %cst = arith.constant dense<0.000000e+00> : vector<8x32xf32>
    %3 = tpu.matmul %1, %2, %cst {dimension_numbers = #tpu.dot_dimension_numbers<[1], [0], [0], [1], [0, 0, 1, 1], [], []>} : vector<8x32xbf16>, vector<32x32xbf16>, vector<8x32xf32> -> vector<8x32xf32>
    %c0_3 = arith.constant 0 : index
    %c0_4 = arith.constant 0 : index
    %4 = vector.load %arg3[%c0_3, %c0_4] : memref<1x32xf32, #tpu.memory_space<vmem>>, vector<1x32xf32>
    %5 = vector.broadcast %4 : vector<1x32xf32> to vector<8x32xf32>
    %6 = arith.addf %3, %5 : vector<8x32xf32>
    %cst_5 = arith.constant 0.000000e+00 : f32
    %7 = vector.broadcast %cst_5 : f32 to vector<8x32xf32>
    %8 = arith.maximumf %6, %7 : vector<8x32xf32>
    %9 = arith.truncf %8 : vector<8x32xf32> to vector<8x32xbf16>
    %c0_6 = arith.constant 0 : index
    %c0_7 = arith.constant 0 : index
    %10 = vector.load %arg4[%c0_6, %c0_7] : memref<32x16xbf16, #tpu.memory_space<vmem>>, vector<32x16xbf16>
    %cst_8 = arith.constant dense<0.000000e+00> : vector<8x16xf32>
    %11 = tpu.matmul %9, %10, %cst_8 {dimension_numbers = #tpu.dot_dimension_numbers<[1], [0], [0], [1], [0, 0, 1, 1], [], []>} : vector<8x32xbf16>, vector<32x16xbf16>, vector<8x16xf32> -> vector<8x16xf32>
    %c0_9 = arith.constant 0 : index
    %c0_10 = arith.constant 0 : index
    %12 = vector.load %arg5[%c0_9, %c0_10] : memref<1x16xf32, #tpu.memory_space<vmem>>, vector<1x16xf32>
    %13 = vector.broadcast %12 : vector<1x16xf32> to vector<8x16xf32>
    %14 = arith.addf %11, %13 : vector<8x16xf32>
    %15 = arith.negf %14 : vector<8x16xf32>
    %16 = math.exp %15 : vector<8x16xf32>
    %cst_11 = arith.constant 1.000000e+00 : f32
    %17 = vector.broadcast %cst_11 : f32 to vector<8x16xf32>
    %18 = arith.addf %17, %16 : vector<8x16xf32>
    %19 = arith.divf %17, %18 : vector<8x16xf32>
    %c0_12 = arith.constant 0 : index
    %c0_13 = arith.constant 0 : index
    %20 = vector.load %arg6[%c0_12, %c0_13] : memref<8x16xf32, #tpu.memory_space<vmem>>, vector<8x16xf32>
    tpu.vector_store %arg6[%c0_12, %c0_13], %19 {strides = array<i32>} : memref<8x16xf32, #tpu.memory_space<vmem>>, vector<8x16xf32>,
    return
  }
  func.func @transform_0(%arg0: i32) -> (i32, i32) {
    %c0_i32 = arith.constant 0 : i32
    %c0_i32_0 = arith.constant 0 : i32
    return %arg0, %c0_i32 : i32, i32
  }
  func.func @transform_1(%arg0: i32) -> (i32, i32) {
    %c0_i32 = arith.constant 0 : i32
    %c0_i32_0 = arith.constant 0 : i32
    %c0_i32_1 = arith.constant 0 : i32
    return %c0_i32, %c0_i32_0 : i32, i32
  }
  func.func @transform_2(%arg0: i32) -> (i32, i32) {
    %c0_i32 = arith.constant 0 : i32
    %c0_i32_0 = arith.constant 0 : i32
    %c0_i32_1 = arith.constant 0 : i32
    return %c0_i32, %c0_i32_0 : i32, i32
  }
  func.func @transform_3(%arg0: i32) -> (i32, i32) {
    %c0_i32 = arith.constant 0 : i32
    %c0_i32_0 = arith.constant 0 : i32
    %c0_i32_1 = arith.constant 0 : i32
    return %c0_i32, %c0_i32_0 : i32, i32
  }
  func.func @transform_4(%arg0: i32) -> (i32, i32) {
    %c0_i32 = arith.constant 0 : i32
    %c0_i32_0 = arith.constant 0 : i32
    %c0_i32_1 = arith.constant 0 : i32
    return %c0_i32, %c0_i32_0 : i32, i32
  }
  func.func @transform_5(%arg0: i32) -> (i32, i32) {
    %c0_i32 = arith.constant 0 : i32
    %c0_i32_0 = arith.constant 0 : i32
    return %arg0, %c0_i32 : i32, i32
  }
}

</mosaic_0001>

<bundles_post_ra>
// kernel: tpu_custom_call.1
= control target key start
LH: loop header
LB: loop body
LE: loop exit
PB: predicated region body
PF: predicated region fallthrough
CT: control target
= control target key end

     0   :  { %10 = vsyncpa [#allocation3], 0  ;;  %s822_s0 = inlined_call_operand.vmem [shape: f32[16,32], index: 0, kind: input, shape index: {}]   ;;  %s823_s1 = inlined_call_operand.hbm [shape: bf16[32,32], index: 1, kind: input, shape index: {}]   ;;  %s824_s2 = inlined_call_operand.vmem [shape: f32[1,32], index: 2, kind: input, shape index: {}]   ;;  %s825_s3 = inlined_call_operand.vmem [shape: bf16[32,16], index: 3, kind: input, shape index: {}]   ;;  %s826_s4 = inlined_call_operand.vmem [shape: f32[1,16], index: 4, kind: input, shape index: {}]   ;;  %s827_s5 = inlined_call_operand.hbm [shape: f32[16,16], index: 5, kind: output, shape index: {}]  }
   0x1   :  { %11 = vsyncpa [#allocation4], 0 }
   0x2   :  { %13 = vsyncpa [#allocation4 + $0x1], 0  ;;  %s699_s18 = smov 0   ;;  %s701_s19 = smov 0  }
   0x3   :  { %s703_s20 = smov 0   ;;  %s705_s21 = smov 0  }
   0x4 LB: > { %s720_s22 = sadd.s32 4294967295, %s661_s21   ;;  %s466_s23 = sadd.s32 4294967294, %s661_s21   ;;  %s661_s21 = sphi %s705_s21, %s835_s21   ;;  %s657_s20 = sphi %s703_s20, %s834_s20   ;;  %s653_s19 = sphi %s701_s19, %s833_s19   ;;  %s649_s18 = sphi %s699_s18, %s832_s18  }
   0x5   : > { %s724_s24 = sadd.s32 1, %s661_s21   ;;  %s136_s25 = sadd.s32 1, %s657_s20 }
   0x6   : > { %s133_s26 = ssub.s32 %s661_s21, %s724_s24  ;;  %p146_p0 = scmp.ne.s32.totalorder %s657_s20, %s653_s19 }
   0x7   : > { %p134_p1 = scmp.eq.s32.totalorder %s133_s26, 0  ;;  %p147_p2 = scmp.eq.s32.totalorder %s720_s22, 1 }
   0x8   : > { %p152_p3 = scmp.ne.s32.totalorder %s653_s19, %s649_s18  ;;  %p153_p4 = scmp.eq.s32.totalorder %s466_s23, 1 }
   0x9   : > { %s735_s27 = scalar_select %p134_p1, %s657_s20, %s136_s25  }
   0xa   : > { %p737_p5 = por %p147_p2, %p146_p0  ;;  %p741_p6 = por %p153_p4, %p152_p3 }
   0xb   : > { %p467_p7 = scmp.ge.s32.totalorder %s661_s21, 1  ;;  %p160_p8 = scmp.lt.s32.totalorder %s661_s21, 3 }
   0xc   : > { %s829_s29 = scalar_select %p741_p6, 1, 0 }
   0xd   : > { %p523_p9 = scmp.eq.s32.totalorder %s720_s22, 0  ;;  %p748_p10 = pnand %p467_p7, %p160_p8 }
   0xe   : > { %s663_s6 = smov [#allocation2]  }
   0xf   : > { %s172_s7 = sshll.u32 %s663_s6, 4  ;;  %p515_p11 = pneg %p748_p10  ;;  %s173_s7 = int_to_ptr.vmem [resolvable:$true] %s172_s7 }
  0x10   : > { %s582_s8 = scalar_lea.vmem %s173_s7, 256  ;;  %p590_p3 = scmp.lt.s32.totalorder %s173_s7, %s173_s7 }
  0x11   : > { %p516_p12 = pnand %p523_p9, %p515_p11  ;;  %p583_p0 = scmp.ne.s32.totalorder %s173_s7, %s582_s8 }
  0x12   : > { %p591_p4 = scmp.lt.s32.totalorder %s582_s8, %s582_s8 }
  0x13   : > { %p573_p13 = pneg %p516_p12 }
  0x14   : > { %p592_p6 = por %p591_p4, %p590_p3 }
  0x15   : > { %p585_p1 = pnand %p583_p0, %p573_p13 }
  0x17   : > { %p586_p2 = pneg %p585_p1 }
  0x19   : > { %p593_p7 = pnand %p592_p6, %p586_p2 }
  0x1b   : > { %596 = shalt.err (!%p593_p7)
}
  0x1c   : > { %s664_s9 = smov 64   ;;  %s665_s10 = smov 4  }
  0x1d   : > { %518 = dma.hbm_to_vmem [thread:$0]  (!%p516_p12), %s823_s1, 256, %s173_s7, [#allocation3], %s664_s9, %s664_s9, %s665_s10  }
  0x1e   : > { %204 = sbr.rel (%p748_p10) target bundleno = 485 (0x1e5), region = 40 }
  0x23   : > { %640 = dma.done.wait (%p523_p9), [#allocation3], 256  }
  0x24   : > { %642 = vsyncadd (%p523_p9), [#allocation3], 4294967040  ;;  %p231_p8 = scmp.lt.s32.totalorder %s720_s22, 1  ;;  %v666_v0 = vmov 0.0   ;;  %vm667_vm0 = vmmov 0   ;;  %v563_v1 = vld [vmem:[#allocation2 + $0x8] sm:$0xff]  }
  0x25   : > { %493 = vmatprep.subr.bf16.mxu0 %v666_v0  ;;  %497 = vmatprep.mubr.msk.bf16.mxu0 %vm667_vm0, %v666_v0  ;;  %v564_v2 = vld [vmem:[#allocation2] sm:$0xff]   ;;  %vm261_vm1 = vcmask 261120   ;;  %v565_v5 = vld [vmem:[%s825_s3 + $0x8] sm:$0xff]   ;;  %s228_s10 = sand.u32 1, %s653_s19   ;;  %s484_s12 = sshll.u32 %s720_s22, 7  ;;  %vm379_vm2 = vcmask 130048  }
  0x26   : > { %s232_s13 = scalar_select %p231_p8, %s720_s22, 1  ;;  %501 = vmatprep.subr.bf16.mxu1 %v666_v0  ;;  %505 = vmatprep.mubr.msk.bf16.mxu1 %vm667_vm0, %v666_v0  ;;  %v566_v6 = vld [vmem:[%s825_s3] sm:$0xff]  }
  0x27   : > { %494 = vmatpush3.bf16.msra.mxu0 %v563_v1  ;;  %502 = vmatpush3.bf16.msra.mxu1 %v565_v5  ;;  %v474_v7 = vld [vmem:[%s824_s2] ss:$0 sm:$0xff]  ;;  %s472_s11 = sshll.u32 %s228_s10, 3  ;;  %s382_s23 = scalar_lea.sflag [#allocation4], %s228_s10 }
  0x28   : > { %s473_s14 = sshll.u32 %s232_s13, 3  ;;  %495 = vmatprep.subr.bf16.mxu0 %v666_v0  ;;  %503 = vmatprep.subr.bf16.mxu1 %v666_v0  ;;  %v478_v15 = vld [vmem:[%s826_s4] ss:$0 sm:$0xff]  ;;  %s230_s13 = scalar_lea.vmem [#allocation5], %s472_s11 }
  0x29   : > { %s234_s17 = scalar_lea.vmem %s822_s0, %s473_s14  ;;  %s395_s14 = sshll.u32 %s230_s13, 4  ;;  %s396_s14 = int_to_ptr.vmem [resolvable:$true] %s395_s14 }
  0x2a   : > { %v236_v3 = vld [vmem:[%s234_s17] sm:$0xff]  ;;  %s787_s17 = scalar_lea.hbm %s827_s5, %s484_s12  ;;  %s597_s25 = scalar_lea.vmem %s396_s14, 128 }
  0x2b   : > { %v237_v4 = vpack.c.bf16 %v236_v3, %v236_v3  ;;  %496 = vmatpush3.bf16.msra.mxu0 %v564_v2  ;;  %504 = vmatpush3.bf16.msra.mxu1 %v566_v6  ;;  %p598_p6 = scmp.ne.s32.totalorder %s396_s14, %s597_s25  ;;  %s668_s26 = smov [#allocation5]  }
  0x2c   : > { %s601_s30 = sshll.u32 %s668_s26, 4  ;;  %s602_s30 = int_to_ptr.vmem [resolvable:$false] %s601_s30 }
  0x2d   : > { %p599_p9 = pnand %p598_p6, %p737_p5  ;;  %s603_s22 = scalar_lea.vmem %s602_s30, 256 }
  0x2e   : > { %498 = vmatmul.mubr.msk.bf16.vlgmr.msra.gmra.mxu0 %vm261_vm1, %v237_v4  ;;  %p604_p11 = scmp.lt.s32.totalorder %s396_s14, %s602_s30  ;;  %p605_p12 = scmp.lt.s32.totalorder %s603_s22, %s597_s25 }
  0x2f   : > { %p600_p10 = pneg %p599_p9 }
  0x30   : > { %p606_p13 = por %p605_p12, %p604_p11 }
  0x32   : > { %p607_p0 = pnand %p606_p13, %p600_p10 }
  0xee   : > { %v299_v8 = vpop.f32.mrf.mxu0 }
  0xef   : > { %v300_v9 = vadd.f32 %v474_v7, %v299_v8 }
  0xf0   : > { %v499_v10 = vpop.f32.mrf.mxu0 }
  0xf1   : > { %v305_v11 = vmax.f32 %v300_v9, 0.0 }
  0xf2   : > { %v302_v12 = vpop.f32.mrf.mxu0 }
  0xf3   : > { %v306_v13 = vpack.c.bf16 %v305_v11, %v305_v11 }
  0xf4   : > { %v500_v14 = vpop.f32.mrf.mxu0 }
  0xf5   : > { %506 = vmatmul.mubr.msk.bf16.vlgmr.msra.gmra.mxu1 %vm261_vm1, %v306_v13 }
 0x1b5   : > { %v367_v16 = vpop.f32.mrf.mxu1 }
 0x1b6   : > { %v368_v17 = vadd.f32 %v478_v15, %v367_v16 }
 0x1b7   : > { %v507_v18 = vpop.f32.mrf.mxu1 }
 0x1b8   : > { %v482_v19 = vmul.f32 -1.442695, %v368_v17 }
 0x1b9   : > { %v370_v20 = vpop.f32.mrf.mxu1 }
 0x1ba   : > { %567 = vpow2.f32 %v482_v19 }
 0x1bb   : > { %v508_v21 = vpop.f32.mrf.mxu1 }
 0x1c7   : > { %v568_v22 = vpop.eup %567 }
 0x1c8   : > { %v376_v23 = vadd.f32 1.0, %v568_v22 }
 0x1ca   : > { %569 = vrcp.f32 %v376_v23 }
 0x1d7   : > { %v570_v24 = vpop.eup %569 }
 0x1d8   : > { %380 = vst.msk [vmem:[%s230_s13] sm:$0xff] %vm379_vm2, %v570_v24 }
 0x1d9   : > { %610 = shalt.err (!%p607_p0)
}
 0x1da   : > { %s611_s6 = scalar_lea.hbm %s787_s17, 128  ;;  %s615_s9 = scalar_lea.hbm %s827_s5, 256 }
 0x1db   : > { %p612_p1 = scmp.ne.s32.totalorder %s787_s17, %s611_s6  ;;  %p616_p4 = scmp.lt.s32.totalorder %s787_s17, %s827_s5 }
 0x1dc   : > { %p617_p7 = scmp.lt.s32.totalorder %s615_s9, %s611_s6 }
 0x1dd   : > { %p613_p2 = pnand %p612_p1, %p737_p5 }
 0x1de   : > { %p618_p8 = por %p617_p7, %p616_p4 }
 0x1df   : > { %p614_p3 = pneg %p613_p2 }
 0x1e1   : > { %p619_p6 = pnand %p618_p8, %p614_p3 }
 0x1e3   : > { %622 = shalt.err (!%p619_p6)
}
 0x1e4   : > { %513 = dma.vmem_to_hbm [thread:$0]  (%p737_p5), %s396_s14, 128, %s787_s17, %s382_s23  }
 0x1e5 PF: > { %p525_p9 = scmp.ge.s32.totalorder %s661_s21, 2  ;;  %s407_s12 = sand.u32 1, %s649_s18  }
 0x1e6   : > { %p831_p10 = scmp.ne.s32.totalorder %s829_s29, 0  ;;  %s408_s13 = scalar_lea.sflag [#allocation4], %s407_s12 }
 0x1e8   : > { %p520_p11 = pnand %p525_p9, %p831_p10 }
 0x1ea   : > { %p521_p12 = pneg %p520_p11 }
 0x1ec   : > { %644 = dma.done.wait (%p521_p12), %s408_s13, 128  }
 0x1ed   : > { %646 = vsyncadd (%p521_p12), %s408_s13, 4294967168  ;;  %p16_p13 = scmp.ge.s32.totalorder %s724_s24, 4   ;;  %s832_s18 = smov %s653_s19 }
 0x1ee   : > { %s833_s19 = smov %s657_s20  ;;  %s834_s20 = smov %s735_s27 }
 0x1ef   : > { %s835_s21 = smov %s724_s24  ;;  %18 = sbr.rel (!%p16_p13) target bundleno = 4 (0x4), region = 80 }
 0x1f4   :  { %413 = vsyncpa [#allocation3], 1 }
 0x1f5   :  { %415 = vsyncpa [#allocation3 + $0x1], 1 }
 0x1f6   :  { %416 = vsyncpa [#allocation4], 1 }
 0x1f7   :  { %418 = vsyncpa [#allocation4 + $0x1], 1 }

</bundles_post_ra>
